<compile_context>
chip_gen: v7x
topology: tpu7x:2x2x1
jax: 0.10.0
libtpu: 0.0.40
codegen_flags: <defaults>
</compile_context>

<pallas_src>
import functools

import jax
import jax.numpy as jnp
from jax.experimental import pallas as pl
from jax.experimental.pallas import tpu as pltpu


def _se_kernel(x_ref, w1_ref, b1_ref, w2_ref, b2_ref, o_ref, *, inv_hw):
    # ---- global average pool (f32 accumulation, no live full-tile f32 copy) ----
    pooled = jnp.sum(x_ref[...].astype(jnp.float32), axis=-1) * inv_hw      # (BN, C)

    # ---- squeeze 1x1 conv (matmul) + Swish ----
    h = jnp.dot(pooled, w1_ref[...].astype(jnp.float32),
                preferred_element_type=jnp.float32)
    h = h + b1_ref[...].astype(jnp.float32)                                 # (BN, mid)
    h = h * jax.nn.sigmoid(h)

    # ---- excite 1x1 conv (matmul) + sigmoid gate ----
    s = jnp.dot(h, w2_ref[...].astype(jnp.float32),
                preferred_element_type=jnp.float32)
    s = s + b2_ref[...].astype(jnp.float32)                                 # (BN, C)
    scale = jax.nn.sigmoid(s).astype(o_ref.dtype)

    # ---- elementwise rescale in the native dtype (re-read, no f32 temp) ----
    o_ref[...] = x_ref[...] * scale[:, :, None]


def se_module(x_nchw, w1, b1, w2, b2, *,
              block_budget_bytes=24 * 1024 * 1024,
              vmem_limit_bytes=48 * 1024 * 1024):
    """x_nchw: (N, C, H, W); w1: (C, mid); b1: (1, mid); w2: (mid, C); b2: (1, C)."""
    N, C, H, W = x_nchw.shape
    mid = w1.shape[1]
    HW = H * W

    x = x_nchw.reshape(N, C, HW)

    dtype_bytes = x.dtype.itemsize
    per_sample_bytes = C * HW * dtype_bytes

    # Batch block: largest bn whose double-buffered in+out traffic fits the
    # steady-state VMEM budget (~ 4x block bytes), capped so the grid has at
    # least 2 programs when N >= 2 (megacore sharding on v7x).
    bn = max(1, block_budget_bytes // (4 * per_sample_bytes))
    bn = min(bn, N)
    if N >= 2:
        bn = min(bn, pl.cdiv(N, 2))
    grid = (pl.cdiv(N, bn),)
    # NOTE: if a single sample exceeds the budget (huge C*HW), bn stays 1 and
    # the block may still exceed vmem_limit_bytes; EfficientNet SE shapes are
    # far below that. # TODO(synk): spatial-split fallback for gigantic tiles.

    param_bytes = (w1.size + b1.size + w2.size + b2.size) * w1.dtype.itemsize
    cost = pl.CostEstimate(
        flops=int(4 * N * C * mid + 4 * N * C * HW),
        transcendentals=int(N * (mid + C)),
        bytes_accessed=int(2 * N * C * HW * dtype_bytes + param_bytes),
    )

    kernel = functools.partial(_se_kernel, inv_hw=1.0 / float(HW))

    out = pl.pallas_call(
        kernel,
        out_shape=jax.ShapeDtypeStruct((N, C, HW), x.dtype),
        grid_spec=pltpu.PrefetchScalarGridSpec(
            num_scalar_prefetch=0,
            grid=grid,
            in_specs=[
                # Trailing block dims (C, HW) equal the full array dims ->
                # legal regardless of (8,128) divisibility; batch axis tiled.
                pl.BlockSpec((bn, C, HW), lambda n: (n, 0, 0)),   # x tile
                pl.BlockSpec(w1.shape, lambda n: (0, 0)),         # W1 resident
                pl.BlockSpec(b1.shape, lambda n: (0, 0)),         # b1 resident
                pl.BlockSpec(w2.shape, lambda n: (0, 0)),         # W2 resident
                pl.BlockSpec(b2.shape, lambda n: (0, 0)),         # b2 resident
            ],
            out_specs=pl.BlockSpec((bn, C, HW), lambda n: (n, 0, 0)),
        ),
        compiler_params=pltpu.CompilerParams(
            dimension_semantics=("parallel",),   # megacore sharding on v7x
            vmem_limit_bytes=vmem_limit_bytes,   # safe on v5e/v6e/v7x
        ),
        cost_estimate=cost,
    )(x, w1, b1, w2, b2)

    return out.reshape(N, C, H, W)


def init_params(key, in_channels, mid_channels):
    """Deterministic synthetic parameters.

    PyTorch Conv2d(in, mid, 1) weight has shape (mid, in, 1, 1); we store the
    transposed matmul form (in, mid) so the kernel does pooled @ W1.
    """
    k1, k2, k3, k4 = jax.random.split(key, 4)
    w1 = jax.random.normal(k1, (in_channels, mid_channels), jnp.float32) * 0.1
    b1 = jax.random.normal(k2, (1, mid_channels), jnp.float32) * 0.1
    w2 = jax.random.normal(k3, (mid_channels, in_channels), jnp.float32) * 0.1
    b2 = jax.random.normal(k4, (1, in_channels), jnp.float32) * 0.1
    return w1, b1, w2, b2


def se_module_ref(x_nchw, w1, b1, w2, b2):
    """Pure-JAX reference matching the PyTorch forward."""
    pooled = jnp.mean(x_nchw, axis=(2, 3))                  # (N, C)
    h = pooled @ w1 + b1[0]
    h = h * jax.nn.sigmoid(h)
    s = h @ w2 + b2[0]
    scale = jax.nn.sigmoid(s)                               # (N, C)
    return x_nchw * scale[:, :, None, None]


if __name__ == "__main__":
    key = jax.random.PRNGKey(0)
    kx, kp = jax.random.split(key)

    N, C, H, W = 2, 4, 16, 16
    mid = 2  # squeeze ratio

    x = jax.random.normal(kx, (N, C, H, W), jnp.float32)
    w1, b1, w2, b2 = init_params(kp, C, mid)

    ref = se_module_ref(x, w1, b1, w2, b2)

    out = se_module(x, w1, b1, w2, b2)
    out = jax.block_until_ready(out)

    assert jnp.allclose(out, ref, atol=1e-5, rtol=1e-5), "mismatch vs reference"

    print("KERNEL_OK")
</pallas_src>

<mosaic_0001>
module attributes {stable_mosaic.version = 11 : i64} {
  func.func @_se_kernel(%arg0: i32, %arg1: memref<1x4x256xf32, #tpu.memory_space<vmem>>, %arg2: memref<4x2xf32, #tpu.memory_space<vmem>>, %arg3: memref<1x2xf32, #tpu.memory_space<vmem>>, %arg4: memref<2x4xf32, #tpu.memory_space<vmem>>, %arg5: memref<1x4xf32, #tpu.memory_space<vmem>>, %arg6: memref<1x4x256xf32, #tpu.memory_space<vmem>>) attributes {dimension_semantics = [#tpu.dimension_semantics<parallel>], iteration_bounds = array<i64: 2>, scalar_prefetch = 0 : i64, scratch_operands = 0 : i64, tpu.core_type = #tpu.core_type<tc>, window_params = [{transform_indices = @transform_0, window_bounds = array<i64: 1, 4, 256>}, {pipeline_mode = #tpu.pipeline_mode<synchronous>, transform_indices = @transform_1, window_bounds = array<i64: 4, 2>}, {pipeline_mode = #tpu.pipeline_mode<synchronous>, transform_indices = @transform_2, window_bounds = array<i64: 1, 2>}, {pipeline_mode = #tpu.pipeline_mode<synchronous>, transform_indices = @transform_3, window_bounds = array<i64: 2, 4>}, {pipeline_mode = #tpu.pipeline_mode<synchronous>, transform_indices = @transform_4, window_bounds = array<i64: 1, 4>}, {transform_indices = @transform_5, window_bounds = array<i64: 1, 4, 256>}]} {
    %c0 = arith.constant 0 : index
    %c0_0 = arith.constant 0 : index
    %c0_1 = arith.constant 0 : index
    %0 = vector.load %arg1[%c0, %c0_0, %c0_1] : memref<1x4x256xf32, #tpu.memory_space<vmem>>, vector<1x4x256xf32>
    %cst = arith.constant dense<0.000000e+00> : vector<1x4xf32>
    %1 = vector.multi_reduction <add>, %0, %cst [2] : vector<1x4x256xf32> to vector<1x4xf32>
    %cst_2 = arith.constant 3.906250e-03 : f32
    %2 = vector.broadcast %cst_2 : f32 to vector<1x4xf32>
    %3 = arith.mulf %1, %2 : vector<1x4xf32>
    %c0_3 = arith.constant 0 : index
    %c0_4 = arith.constant 0 : index
    %4 = vector.load %arg2[%c0_3, %c0_4] : memref<4x2xf32, #tpu.memory_space<vmem>>, vector<4x2xf32>
    %cst_5 = arith.constant dense<0.000000e+00> : vector<1x2xf32>
    %5 = tpu.matmul %3, %4, %cst_5 {dimension_numbers = #tpu.dot_dimension_numbers<[1], [0], [0], [1], [0, 0, 1, 1], [], []>} : vector<1x4xf32>, vector<4x2xf32>, vector<1x2xf32> -> vector<1x2xf32>
    %c0_6 = arith.constant 0 : index
    %c0_7 = arith.constant 0 : index
    %6 = vector.load %arg3[%c0_6, %c0_7] : memref<1x2xf32, #tpu.memory_space<vmem>>, vector<1x2xf32>
    %7 = arith.addf %5, %6 : vector<1x2xf32>
    %8 = arith.negf %7 : vector<1x2xf32>
    %9 = math.exp %8 : vector<1x2xf32>
    %cst_8 = arith.constant 1.000000e+00 : f32
    %10 = vector.broadcast %cst_8 : f32 to vector<1x2xf32>
    %11 = arith.addf %10, %9 : vector<1x2xf32>
    %12 = arith.divf %10, %11 : vector<1x2xf32>
    %13 = arith.mulf %7, %12 : vector<1x2xf32>
    %c0_9 = arith.constant 0 : index
    %c0_10 = arith.constant 0 : index
    %14 = vector.load %arg4[%c0_9, %c0_10] : memref<2x4xf32, #tpu.memory_space<vmem>>, vector<2x4xf32>
    %cst_11 = arith.constant dense<0.000000e+00> : vector<1x4xf32>
    %15 = tpu.matmul %13, %14, %cst_11 {dimension_numbers = #tpu.dot_dimension_numbers<[1], [0], [0], [1], [0, 0, 1, 1], [], []>} : vector<1x2xf32>, vector<2x4xf32>, vector<1x4xf32> -> vector<1x4xf32>
    %c0_12 = arith.constant 0 : index
    %c0_13 = arith.constant 0 : index
    %16 = vector.load %arg5[%c0_12, %c0_13] : memref<1x4xf32, #tpu.memory_space<vmem>>, vector<1x4xf32>
    %17 = arith.addf %15, %16 : vector<1x4xf32>
    %18 = arith.negf %17 : vector<1x4xf32>
    %19 = math.exp %18 : vector<1x4xf32>
    %cst_14 = arith.constant 1.000000e+00 : f32
    %20 = vector.broadcast %cst_14 : f32 to vector<1x4xf32>
    %21 = arith.addf %20, %19 : vector<1x4xf32>
    %22 = arith.divf %20, %21 : vector<1x4xf32>
    %c0_15 = arith.constant 0 : index
    %c0_16 = arith.constant 0 : index
    %c0_17 = arith.constant 0 : index
    %23 = vector.load %arg1[%c0_15, %c0_16, %c0_17] : memref<1x4x256xf32, #tpu.memory_space<vmem>>, vector<1x4x256xf32>
    %24 = vector.shape_cast %22 : vector<1x4xf32> to vector<1x4x1xf32>
    %25 = vector.broadcast %24 : vector<1x4x1xf32> to vector<1x4x256xf32>
    %26 = arith.mulf %23, %25 : vector<1x4x256xf32>
    %c0_18 = arith.constant 0 : index
    %c0_19 = arith.constant 0 : index
    %c0_20 = arith.constant 0 : index
    %27 = vector.load %arg6[%c0_18, %c0_19, %c0_20] : memref<1x4x256xf32, #tpu.memory_space<vmem>>, vector<1x4x256xf32>
    tpu.vector_store %arg6[%c0_18, %c0_19, %c0_20], %26 {strides = array<i32>} : memref<1x4x256xf32, #tpu.memory_space<vmem>>, vector<1x4x256xf32>,
    return
  }
  func.func @transform_0(%arg0: i32) -> (i32, i32, i32) {
    %c0_i32 = arith.constant 0 : i32
    %c0_i32_0 = arith.constant 0 : i32
    %c0_i32_1 = arith.constant 0 : i32
    return %arg0, %c0_i32, %c0_i32_0 : i32, i32, i32
  }
  func.func @transform_1(%arg0: i32) -> (i32, i32) {
    %c0_i32 = arith.constant 0 : i32
    %c0_i32_0 = arith.constant 0 : i32
    %c0_i32_1 = arith.constant 0 : i32
    return %c0_i32, %c0_i32_0 : i32, i32
  }
  func.func @transform_2(%arg0: i32) -> (i32, i32) {
    %c0_i32 = arith.constant 0 : i32
    %c0_i32_0 = arith.constant 0 : i32
    %c0_i32_1 = arith.constant 0 : i32
    return %c0_i32, %c0_i32_0 : i32, i32
  }
  func.func @transform_3(%arg0: i32) -> (i32, i32) {
    %c0_i32 = arith.constant 0 : i32
    %c0_i32_0 = arith.constant 0 : i32
    %c0_i32_1 = arith.constant 0 : i32
    return %c0_i32, %c0_i32_0 : i32, i32
  }
  func.func @transform_4(%arg0: i32) -> (i32, i32) {
    %c0_i32 = arith.constant 0 : i32
    %c0_i32_0 = arith.constant 0 : i32
    %c0_i32_1 = arith.constant 0 : i32
    return %c0_i32, %c0_i32_0 : i32, i32
  }
  func.func @transform_5(%arg0: i32) -> (i32, i32, i32) {
    %c0_i32 = arith.constant 0 : i32
    %c0_i32_0 = arith.constant 0 : i32
    %c0_i32_1 = arith.constant 0 : i32
    return %arg0, %c0_i32, %c0_i32_0 : i32, i32, i32
  }
}

</mosaic_0001>

<bundles_post_ra>
// kernel: tpu_custom_call.1
= control target key start
LH: loop header
LB: loop body
LE: loop exit
PB: predicated region body
PF: predicated region fallthrough
CT: control target
= control target key end

     0   :  { %10 = vsyncpa [#allocation3], 0  ;;  %s937_s0 = inlined_call_operand.hbm [shape: f32[2,4,256], index: 0, kind: input, shape index: {}]   ;;  %s938_s1 = inlined_call_operand.vmem [shape: f32[4,2], index: 1, kind: input, shape index: {}]   ;;  %s939_s2 = inlined_call_operand.vmem [shape: f32[1,2], index: 2, kind: input, shape index: {}]   ;;  %s940_s3 = inlined_call_operand.vmem [shape: f32[2,4], index: 3, kind: input, shape index: {}]   ;;  %s941_s4 = inlined_call_operand.vmem [shape: f32[1,4], index: 4, kind: input, shape index: {}]   ;;  %s942_s5 = inlined_call_operand.hbm [shape: f32[2,4,256], index: 5, kind: output, shape index: {}]  }
   0x1   :  { %12 = vsyncpa [#allocation3 + $0x1], 0 }
   0x2   :  { %13 = vsyncpa [#allocation4], 0 }
   0x3   :  { %15 = vsyncpa [#allocation4 + $0x1], 0  ;;  %s760_s18 = smov 0   ;;  %s762_s19 = smov 0  }
   0x4   :  { %s764_s20 = smov 0   ;;  %s766_s21 = smov 0  }
   0x5 LB: > { %s781_s22 = sadd.s32 4294967295, %s723_s21   ;;  %s533_s23 = sadd.s32 4294967294, %s723_s21   ;;  %s723_s21 = sphi %s766_s21, %s957_s21   ;;  %s719_s20 = sphi %s764_s20, %s956_s20   ;;  %s715_s19 = sphi %s762_s19, %s955_s19   ;;  %s711_s18 = sphi %s760_s18, %s954_s18  }
   0x6   : > { %s785_s24 = sadd.s32 1, %s723_s21   ;;  %s28_s25 = sadd.s32 1, %s719_s20 }
   0x7   : > { %s25_s26 = ssub.s32 %s723_s21, %s785_s24  ;;  %p35_p0 = scmp.ne.s32.totalorder %s719_s20, %s715_s19 }
   0x8   : > { %p26_p1 = scmp.eq.s32.totalorder %s25_s26, 0  ;;  %p36_p2 = scmp.eq.s32.totalorder %s723_s21, 0 }
   0x9   : > { %p41_p3 = scmp.ne.s32.totalorder %s715_s19, %s711_s18  ;;  %p42_p4 = scmp.eq.s32.totalorder %s781_s22, 0 }
   0xa   : > { %s797_s27 = scalar_select %p26_p1, %s719_s20, %s28_s25  }
   0xb   : > { %p799_p5 = por %p36_p2, %p35_p0  ;;  %p803_p6 = por %p42_p4, %p41_p3 }
   0xc   : > { %p149_p7 = scmp.eq.s32.totalorder %s781_s22, 1  ;;  %p155_p8 = scmp.eq.s32.totalorder %s533_s23, 1 }
   0xd   : > { %p581_p10 = scmp.lt.s32.totalorder %s723_s21, 2  ;;  %s187_s7 = sand.u32 1, %s719_s20  }
   0xe   : > { %p810_p11 = por %p149_p7, %p35_p0  ;;  %p814_p12 = por %p155_p8, %p41_p3 }
   0xf   : > { %s553_s8 = sshll.u32 %s723_s21, 7  ;;  %s536_s9 = sshll.u32 %s187_s7, 3 }
  0x10   : > { %s946_s30 = scalar_select %p810_p11, 1, 0 }
  0x11   : > { %s947_s6 = scalar_select %p814_p12, 1, 0 }
  0x12   : > { %s823_s12 = scalar_lea.hbm %s937_s0, %s553_s8  ;;  %s191_s13 = scalar_lea.vmem [#allocation2], %s536_s9 }
  0x13   : > { %s199_s14 = sshll.u32 %s191_s13, 4  ;;  %p827_p13 = pnand %p581_p10, %p799_p5  ;;  %s831_s14 = int_to_ptr.vmem [resolvable:$true] %s199_s14 }
  0x14   : > { %s188_s16 = scalar_lea.sflag [#allocation3], %s187_s7  ;;  %s627_s17 = scalar_lea.hbm %s823_s12, 128 }
  0x15   : > { %p628_p2 = scmp.ne.s32.totalorder %s823_s12, %s627_s17  ;;  %p629_p3 = pneg %p827_p13 }
  0x16   : > { %s632_s26 = scalar_lea.hbm %s937_s0, 256  ;;  %p633_p5 = scmp.lt.u32.totalorder %s823_s12, %s937_s0 }
  0x17   : > { %p630_p4 = pnand %p629_p3, %p628_p2  ;;  %p634_p8 = scmp.lt.u32.totalorder %s632_s26, %s627_s17 }
  0x18   : > { %p636_p9 = scmp.lt.u32.totalorder %s627_s17, %s823_s12 }
  0x19   : > { %p631_p7 = pneg %p630_p4  ;;  %p635_p10 = por %p634_p8, %p633_p5 }
  0x1b   : > { %p637_p0 = por %p636_p9, %p635_p10 }
  0x1d   : > { %p638_p1 = pnand %p637_p0, %p631_p7 }
  0x1f   : > { %641 = shalt.err (!%p638_p1)
}
  0x20   : > { %s642_s7 = scalar_lea.vmem %s831_s14, 128  ;;  %s725_s9 = smov [#allocation2]  }
  0x21   : > { %p643_p2 = scmp.ne.s32.totalorder %s831_s14, %s642_s7  ;;  %s647_s10 = sshll.u32 %s725_s9, 4  ;;  %s648_s10 = int_to_ptr.vmem [resolvable:$false] %s647_s10 }
  0x22   : > { %s649_s11 = scalar_lea.vmem %s648_s10, 256  ;;  %p650_p11 = scmp.lt.s32.totalorder %s831_s14, %s648_s10 }
  0x23   : > { %p645_p4 = pnand %p643_p2, %p629_p3  ;;  %p651_p5 = scmp.lt.s32.totalorder %s649_s11, %s642_s7 }
  0x25   : > { %p646_p12 = pneg %p645_p4  ;;  %p652_p8 = por %p651_p5, %p650_p11 }
  0x27   : > { %p653_p9 = pnand %p652_p8, %p646_p12 }
  0x29   : > { %656 = shalt.err (!%p653_p9)
}
  0x2a   : > { %576 = dma.hbm_to_vmem [thread:$0]  (!%p827_p13), %s823_s12, 128, %s831_s14, %s188_s16  }
  0x2b   : > { %p949_p0 = scmp.lt.s32.totalorder %s723_s21, 3  ;;  %p950_p1 = scmp.ge.s32.totalorder %s723_s21, 1 }
  0x2d   : > { %p205_p3 = pnand %p950_p1, %p949_p0 }
  0x2e   : > { %s865_s13 = sand.u32 (!%p205_p3), 1, %s715_s19  }
  0x2f   : > { %208 = sbr.rel (%p205_p3) target bundleno = 824 (0x338), region = 40  ;;  %s540_s17 = sshll.u32 (!%p205_p3), %s865_s13, 3 }
  0x30   : > { %s211_s23 = scalar_lea.sflag (!%p205_p3), [#allocation3], %s865_s13  ;;  %s214_s15 = scalar_lea.vmem (!%p205_p3), [#allocation2], %s540_s17 }
  0x36   : > { %702 = dma.done.wait (%p803_p6), %s211_s23, 128  }
  0x37   : > { %704 = vsyncadd (%p803_p6), %s211_s23, 4294967168  ;;  %vm245_vm0 = vcmask 1043456   ;;  %v241_v0 = vld [vmem:[%s214_s15] sm:$0xff]  ;;  %v726_v5 = vmov 0.0   ;;  %vm727_vm1 = vmmov 0   ;;  %v255_v7 = vlaneseq  ;;  %s554_s7 = sshll.u32 %s781_s22, 7 }
  0x38   : > { %v243_v1 = vcombine.high %v241_v0, %v241_v0  ;;  %v246_v2 = vsel %vm245_vm0, %v241_v0, 0.0  ;;  %559 = vmatprep.subr.mxu0 %v726_v5  ;;  %v252_v6 = vld [vmem:[%s938_s1] sm:$0xf]  ;;  %564 = vmatprep.subr.mxu1 %v726_v5  ;;  %vm261_vm2 = vcmask 31744   ;;  %vm350_vm3 = vcmask 1041408   ;;  %s240_s9 = scalar_lea.vmem [#allocation5], %s540_s17  ;;  %s893_s15 = scalar_lea.hbm %s942_s5, %s554_s7 }
  0x39   : > { %560 = vmatpush3.msk.msra.mxu0 %vm245_vm0, %v252_v6  ;;  %561 = vmatprep.mubr.msk.f32.mxu0 %vm727_vm1, %v726_v5  ;;  %v256_v8 = vand.u32 127, %v255_v7  ;;  %v258_v9 = vshrl.u32 %v255_v7, 7  ;;  %v344_v14 = vld [vmem:[%s940_s3] sm:$0x3]  ;;  %vm346_vm4 = vcmask 15360   ;;  %s463_s10 = sshll.u32 %s240_s9, 4  ;;  %s895_s10 = int_to_ptr.vmem [resolvable:$true] %s463_s10 }
  0x3a   : > { %v247_v3 = vsel %vm245_vm0, %v243_v1, 0.0  ;;  %566 = vmatprep.mubr.msk.f32.mxu1 %vm727_vm1, %v726_v5  ;;  %565 = vmatpush3.msk.msra.mxu1 %vm350_vm3, %v344_v14  ;;  %v253_v15 = vld [vmem:[%s939_s2] sm:$0x1]  ;;  %v728_v34 = vmov 839922192   ;;  %s449_s12 = scalar_lea.sflag [#allocation4], %s865_s13 }
  0x3b   : > { %v248_v4 = vadd.f32 %v247_v3, %v246_v2  ;;  %v259_v10 = vsub.s32 %v256_v8, %v258_v9  ;;  %v345_v24 = vld [vmem:[%s941_s4] sm:$0x1]  ;;  %v432_v31 = vsub.s32 0, %v258_v9  ;;  %v439_v35 = vunpack.c.l.s4 %v728_v34  ;;  %s657_s14 = scalar_lea.vmem %s895_s10, 128  ;;  %p951_p11 = scmp.ne.s32.totalorder %s946_s30, 0 }
  0x3c   : > { %p658_p6 = scmp.ne.s32.totalorder %s895_s10, %s657_s14  ;;  %s729_s22 = smov [#allocation5]  }
  0x3d   : > { %249 = vadd.xlane.f32.xlu0 %v248_v4  ;;  %v440_v36 = vunpack.c.0.s8 %v439_v35  ;;  %s661_s17 = sshll.u32 %s729_s22, 4  ;;  %s662_s17 = int_to_ptr.vmem [resolvable:$false] %s661_s17 }
  0x3e   : > { %p659_p12 = pnand %p658_p6, %p951_p11  ;;  %s663_s29 = scalar_lea.vmem %s662_s17, 256 }
  0x3f   : > { %v443_v37 = vsub.s32 %v440_v36, %v258_v9  ;;  %p664_p7 = scmp.lt.s32.totalorder %s895_s10, %s662_s17  ;;  %p665_p10 = scmp.lt.s32.totalorder %s663_s29, %s657_s14 }
  0x40   : > { %p660_p13 = pneg %p659_p12 }
  0x41   : > { %p666_p2 = por %p665_p10, %p664_p7 }
  0x43   : > { %p667_p4 = pnand %p666_p2, %p660_p13 }
  0xca   : > { %v250_v11 = vpop.xlane.xlu0 %249 }
  0xcb   : > { %v251_v12 = vmul.f32 0.00390625, %v250_v11 }
  0xcd   : > { %v260_v13 = vrot.slane %v251_v12, %v259_v10 }
  0xcf   : > { %562 = vmatmul.mubr.msk.f32.vlgmr.msra.gmra.mrb[0].mxu0 %vm261_vm2, %v260_v13 }
 0x1a2   : > { %v333_v16 = vpop.f32.mrb[0].mxu0 }
 0x1a3   : > { %v334_v17 = vadd.f32 %v333_v16, %v253_v15  ;;  %v563_v18 = vpop.f32.mrb[1].mxu0 }
 0x1a5   : > { %v544_v19 = vmul.f32 -1.442695, %v334_v17 }
 0x1a7   : > { %619 = vpow2.f32 %v544_v19 }
 0x1b1   : > { %v620_v20 = vpop.eup %619 }
 0x1b2   : > { %v340_v21 = vadd.f32 1.0, %v620_v20 }
 0x1b4   : > { %621 = vrcp.f32 %v340_v21 }
 0x1be   : > { %v622_v22 = vpop.eup %621 }
 0x1bf   : > { %v343_v23 = vmul.f32 %v622_v22, %v334_v17 }
 0x1c1   : > { %567 = vmatmul.mubr.msk.f32.vlgmr.msra.gmra.mrb[0].mxu1 %vm346_vm4, %v343_v23 }
 0x294   : > { %v420_v25 = vpop.f32.mrb[0].mxu1 }
 0x295   : > { %v421_v26 = vadd.f32 %v420_v25, %v345_v24  ;;  %v568_v27 = vpop.f32.mrb[1].mxu1 }
 0x297   : > { %v547_v28 = vmul.f32 -1.442695, %v421_v26 }
 0x299   : > { %623 = vpow2.f32 %v547_v28 }
 0x2a3   : > { %v624_v29 = vpop.eup %623 }
 0x2a4   : > { %v427_v30 = vadd.f32 1.0, %v624_v29 }
 0x2a6   : > { %625 = vrcp.f32 %v427_v30 }
 0x2b0   : > { %v626_v32 = vpop.eup %625 }
 0x2b1   : > { %v433_v33 = vrot.slane %v626_v32, %v432_v31 }
 0x2b3   : > { %435 = vbcast.lane.b32.xlu0 %v433_v33, 256 }
 0x325   : > { %v436_v38 = vpop.permute.xlu0 %435 }
 0x326   : > { %v444_v39 = vrot.slane %v436_v38, %v443_v37 }
 0x328   : > { %v446_v40 = vmul.f32 %v444_v39, %v241_v0 }
 0x32a   : > { %447 = vst [vmem:[%s240_s9] sm:$0xff] %v446_v40 }
 0x32b   : > { %670 = shalt.err (!%p667_p4)
}
 0x32c   : > { %s671_s13 = scalar_lea.hbm %s893_s15, 128  ;;  %s675_s26 = scalar_lea.hbm %s942_s5, 256 }
 0x32d   : > { %p672_p5 = scmp.ne.s32.totalorder %s893_s15, %s671_s13  ;;  %p676_p0 = scmp.lt.u32.totalorder %s893_s15, %s942_s5 }
 0x32e   : > { %p677_p1 = scmp.lt.u32.totalorder %s675_s26, %s671_s13  ;;  %p679_p6 = scmp.lt.u32.totalorder %s671_s13, %s893_s15 }
 0x32f   : > { %p673_p8 = pnand %p672_p5, %p951_p11 }
 0x330   : > { %p678_p3 = por %p677_p1, %p676_p0 }
 0x331   : > { %p674_p9 = pneg %p673_p8 }
 0x332   : > { %p680_p12 = por %p679_p6, %p678_p3 }
 0x334   : > { %p681_p13 = pnand %p680_p12, %p674_p9 }
 0x336   : > { %684 = shalt.err (!%p681_p13)
}
 0x337   : > { %571 = dma.vmem_to_hbm [thread:$0]  (%p951_p11), %s895_s10, 128, %s893_s15, %s449_s12  }
 0x338 PF: > { %s475_s7 = sand.u32 1, %s711_s18   ;;  %p952_p7 = scmp.ne.s32.totalorder %s947_s6, 0 }
 0x339   : > { %p953_p10 = scmp.ge.s32.totalorder %s723_s21, 2  ;;  %s476_s9 = scalar_lea.sflag [#allocation4], %s475_s7 }
 0x33b   : > { %p578_p2 = pnand %p953_p10, %p952_p7 }
 0x33d   : > { %706 = dma.done.wait (!%p578_p2), %s476_s9, 128  }
 0x33e   : > { %708 = vsyncadd (!%p578_p2), %s476_s9, 4294967168  ;;  %p18_p4 = scmp.ge.s32.totalorder %s785_s24, 4   ;;  %s954_s18 = smov %s715_s19 }
 0x33f   : > { %s955_s19 = smov %s719_s20  ;;  %s956_s20 = smov %s797_s27 }
 0x340   : > { %s957_s21 = smov %s785_s24  ;;  %20 = sbr.rel (!%p18_p4) target bundleno = 5 (0x5), region = 85 }
 0x347   :  { %481 = vsyncpa [#allocation3], 1 }
 0x348   :  { %483 = vsyncpa [#allocation3 + $0x1], 1 }
 0x349   :  { %484 = vsyncpa [#allocation4], 1 }
 0x34a   :  { %486 = vsyncpa [#allocation4 + $0x1], 1 }

</bundles_post_ra>
